<compile_context>
chip_gen: v6e
topology: v6e:2x2x1
jax: 0.10.0
libtpu: 0.0.40
codegen_flags: <defaults>
</compile_context>

<pallas_src>
import functools

import numpy as np
import jax
import jax.numpy as jnp
from jax.experimental import pallas as pl
from jax.experimental.pallas import tpu as pltpu


_BLUR_TAPS = {
    1: [1.0],
    2: [1.0, 1.0],
    3: [1.0, 2.0, 1.0],
    4: [1.0, 3.0, 3.0, 1.0],
    5: [1.0, 4.0, 6.0, 4.0, 1.0],
    6: [1.0, 5.0, 10.0, 10.0, 5.0, 1.0],
    7: [1.0, 6.0, 15.0, 20.0, 15.0, 6.0, 1.0],
}


def blur_kernel_2d(size: int) -> np.ndarray:
    """Normalized 2D binomial kernel (typical Filter2D input in upfirdn.py)."""
    k = np.asarray(_BLUR_TAPS[size], dtype=np.float32)
    k2 = k[None, :] * k[:, None]
    return k2 / k2.sum()


def _filter2d_plane_kernel(x_ref, o_ref, *, taps, oh, ow):
    """Depthwise VALID filter on a (Kc, H, W) block of channel planes.

    taps: static tuple of (row_offset, col_offset, weight) Python constants.
    """
    x = x_ref[...].astype(jnp.float32)              # cast once, not per tap
    kc = x.shape[0]
    acc = jnp.zeros((kc, oh, ow), jnp.float32)
    for a, b, w in taps:                            # static, unrolled FMA loop
        acc = acc + w * x[:, a:a + oh, b:b + ow]
    o_ref[...] = acc.astype(o_ref.dtype)


def _choose_block_planes(n_planes: int, plane_bytes: int,
                         target_block_bytes: int) -> int:
    """Largest divisor of n_planes whose input tile fits target_block_bytes.

    Prefers an even number of grid steps (v7x shards the parallel grid axis
    across 2 TensorCores) as long as that does not shrink the tile > 2x.
    """
    cap = max(1, target_block_bytes // max(plane_bytes, 1))
    divisors = [d for d in range(1, n_planes + 1) if n_planes % d == 0]
    fitting = [d for d in divisors if d <= cap] or [1]
    best = max(fitting)
    even_grid = [d for d in fitting if (n_planes // d) % 2 == 0]
    if even_grid:
        best_even = max(even_grid)
        if 2 * best_even >= best:
            best = best_even
    return best


def filter2d_pallas(x: jax.Array, kernel2d,
                    *, target_block_bytes: int = 2 * 1024 * 1024) -> jax.Array:
    """Pallas implementation of Filter2D(channels, kernel).forward(x).

    x:        (B, C, H, W)
    kernel2d: (K, K) filter shared by every channel (Filter2D repeats one
              kernel over all channels).
    returns:  (B, C, H - K + 1, W - K + 1)
    """
    k2d = np.asarray(kernel2d, dtype=np.float32)
    assert k2d.ndim == 2 and k2d.shape[0] == k2d.shape[1]
    K = k2d.shape[0]
    B, C, H, W = x.shape
    OH, OW = H - K + 1, W - K + 1
    assert OH >= 1 and OW >= 1, "filter larger than input"

    # Static taps (row offset, col offset, weight); zero weights are skipped.
    taps = tuple((a, b, float(k2d[a, b]))
                 for a in range(K) for b in range(K) if float(k2d[a, b]) != 0.0)

    n_planes = B * C
    plane_bytes = H * W * x.dtype.itemsize
    kc = _choose_block_planes(n_planes, plane_bytes, target_block_bytes)
    grid = (n_planes // kc,)

    x_planes = x.reshape(n_planes, H, W)            # free reshape, no copy

    kern = functools.partial(_filter2d_plane_kernel, taps=taps, oh=OH, ow=OW)
    out = pl.pallas_call(
        kern,
        out_shape=jax.ShapeDtypeStruct((n_planes, OH, OW), x.dtype),
        grid=grid,
        in_specs=[pl.BlockSpec((kc, H, W), lambda i: (i, 0, 0))],
        out_specs=pl.BlockSpec((kc, OH, OW), lambda i: (i, 0, 0)),
        compiler_params=pltpu.CompilerParams(
            dimension_semantics=("parallel",)),
    )(x_planes)
    return out.reshape(B, C, OH, OW)


def filter2d_reference(x: jax.Array, kernel2d) -> jax.Array:
    """Literal re-implementation of Filter2D.forward (pure JAX), for checking."""
    B, C, H, W = x.shape
    k2d = jnp.asarray(np.asarray(kernel2d), dtype=x.dtype)
    K = k2d.shape[0]
    filt = jnp.broadcast_to(k2d[None, None], (C, 1, K, K))
    return jax.lax.conv_general_dilated(
        x, filt, window_strides=(1, 1), padding="VALID",
        dimension_numbers=("NCHW", "OIHW", "NCHW"), feature_group_count=C)


if __name__ == "__main__":
    key = jax.random.PRNGKey(0)
    B, C, H, W = 2, 4, 16, 16
    kernel_size = 4
    x = jax.random.normal(key, (B, C, H, W), dtype=jnp.float32)
    k2d = blur_kernel_2d(kernel_size)

    # Primary run: f32, K=4.
    out = filter2d_pallas(x, k2d)
    jax.block_until_ready(out)
    ref = filter2d_reference(x, k2d)
    assert out.shape == ref.shape == (B, C, H - kernel_size + 1, W - kernel_size + 1)
    np.testing.assert_allclose(np.asarray(out), np.asarray(ref),
                               rtol=1e-5, atol=1e-5)

    # Extra coverage (per review): odd kernel size.
    k3 = blur_kernel_2d(3)
    out3 = filter2d_pallas(x, k3)
    ref3 = filter2d_reference(x, k3)
    np.testing.assert_allclose(np.asarray(out3), np.asarray(ref3),
                               rtol=1e-5, atol=1e-5)

    # Extra coverage (per review): bf16 HBM dtype (f32 accumulation inside).
    xb = x.astype(jnp.bfloat16)
    outb = filter2d_pallas(xb, k2d)
    refb = filter2d_reference(xb.astype(jnp.float32), k2d)
    np.testing.assert_allclose(np.asarray(outb, dtype=np.float32),
                               np.asarray(refb), rtol=2e-2, atol=2e-2)

    print("KERNEL_OK")
</pallas_src>

<mosaic_0001>
module attributes {stable_mosaic.version = 11 : i64} {
  func.func @_filter2d_plane_kernel(%arg0: i32, %arg1: memref<4x16x16xf32, #tpu.memory_space<vmem>>, %arg2: memref<4x13x13xf32, #tpu.memory_space<vmem>>) attributes {dimension_semantics = [#tpu.dimension_semantics<parallel>], iteration_bounds = array<i64: 2>, scalar_prefetch = 0 : i64, scratch_operands = 0 : i64, tpu.core_type = #tpu.core_type<tc>, window_params = [{transform_indices = @transform_0, window_bounds = array<i64: 4, 16, 16>}, {transform_indices = @transform_1, window_bounds = array<i64: 4, 13, 13>}]} {
    %c0 = arith.constant 0 : index
    %c0_0 = arith.constant 0 : index
    %c0_1 = arith.constant 0 : index
    %0 = vector.load %arg1[%c0, %c0_0, %c0_1] : memref<4x16x16xf32, #tpu.memory_space<vmem>>, vector<4x16x16xf32>
    %cst = arith.constant 0.000000e+00 : f32
    %1 = vector.broadcast %cst : f32 to vector<4x13x13xf32>
    %2 = vector.extract_strided_slice %0 {offsets = [0, 0, 0], sizes = [4, 13, 13], strides = [1, 1, 1]} : vector<4x16x16xf32> to vector<4x13x13xf32>
    %cst_2 = arith.constant 1.562500e-02 : f32
    %3 = vector.broadcast %cst_2 : f32 to vector<4x13x13xf32>
    %4 = arith.mulf %3, %2 : vector<4x13x13xf32>
    %5 = arith.addf %1, %4 : vector<4x13x13xf32>
    %6 = vector.extract_strided_slice %0 {offsets = [0, 0, 1], sizes = [4, 13, 13], strides = [1, 1, 1]} : vector<4x16x16xf32> to vector<4x13x13xf32>
    %cst_3 = arith.constant 4.687500e-02 : f32
    %7 = vector.broadcast %cst_3 : f32 to vector<4x13x13xf32>
    %8 = arith.mulf %7, %6 : vector<4x13x13xf32>
    %9 = arith.addf %5, %8 : vector<4x13x13xf32>
    %10 = vector.extract_strided_slice %0 {offsets = [0, 0, 2], sizes = [4, 13, 13], strides = [1, 1, 1]} : vector<4x16x16xf32> to vector<4x13x13xf32>
    %cst_4 = arith.constant 4.687500e-02 : f32
    %11 = vector.broadcast %cst_4 : f32 to vector<4x13x13xf32>
    %12 = arith.mulf %11, %10 : vector<4x13x13xf32>
    %13 = arith.addf %9, %12 : vector<4x13x13xf32>
    %14 = vector.extract_strided_slice %0 {offsets = [0, 0, 3], sizes = [4, 13, 13], strides = [1, 1, 1]} : vector<4x16x16xf32> to vector<4x13x13xf32>
    %cst_5 = arith.constant 1.562500e-02 : f32
    %15 = vector.broadcast %cst_5 : f32 to vector<4x13x13xf32>
    %16 = arith.mulf %15, %14 : vector<4x13x13xf32>
    %17 = arith.addf %13, %16 : vector<4x13x13xf32>
    %18 = vector.extract_strided_slice %0 {offsets = [0, 1, 0], sizes = [4, 13, 13], strides = [1, 1, 1]} : vector<4x16x16xf32> to vector<4x13x13xf32>
    %cst_6 = arith.constant 4.687500e-02 : f32
    %19 = vector.broadcast %cst_6 : f32 to vector<4x13x13xf32>
    %20 = arith.mulf %19, %18 : vector<4x13x13xf32>
    %21 = arith.addf %17, %20 : vector<4x13x13xf32>
    %22 = vector.extract_strided_slice %0 {offsets = [0, 1, 1], sizes = [4, 13, 13], strides = [1, 1, 1]} : vector<4x16x16xf32> to vector<4x13x13xf32>
    %cst_7 = arith.constant 1.406250e-01 : f32
    %23 = vector.broadcast %cst_7 : f32 to vector<4x13x13xf32>
    %24 = arith.mulf %23, %22 : vector<4x13x13xf32>
    %25 = arith.addf %21, %24 : vector<4x13x13xf32>
    %26 = vector.extract_strided_slice %0 {offsets = [0, 1, 2], sizes = [4, 13, 13], strides = [1, 1, 1]} : vector<4x16x16xf32> to vector<4x13x13xf32>
    %cst_8 = arith.constant 1.406250e-01 : f32
    %27 = vector.broadcast %cst_8 : f32 to vector<4x13x13xf32>
    %28 = arith.mulf %27, %26 : vector<4x13x13xf32>
    %29 = arith.addf %25, %28 : vector<4x13x13xf32>
    %30 = vector.extract_strided_slice %0 {offsets = [0, 1, 3], sizes = [4, 13, 13], strides = [1, 1, 1]} : vector<4x16x16xf32> to vector<4x13x13xf32>
    %cst_9 = arith.constant 4.687500e-02 : f32
    %31 = vector.broadcast %cst_9 : f32 to vector<4x13x13xf32>
    %32 = arith.mulf %31, %30 : vector<4x13x13xf32>
    %33 = arith.addf %29, %32 : vector<4x13x13xf32>
    %34 = vector.extract_strided_slice %0 {offsets = [0, 2, 0], sizes = [4, 13, 13], strides = [1, 1, 1]} : vector<4x16x16xf32> to vector<4x13x13xf32>
    %cst_10 = arith.constant 4.687500e-02 : f32
    %35 = vector.broadcast %cst_10 : f32 to vector<4x13x13xf32>
    %36 = arith.mulf %35, %34 : vector<4x13x13xf32>
    %37 = arith.addf %33, %36 : vector<4x13x13xf32>
    %38 = vector.extract_strided_slice %0 {offsets = [0, 2, 1], sizes = [4, 13, 13], strides = [1, 1, 1]} : vector<4x16x16xf32> to vector<4x13x13xf32>
    %cst_11 = arith.constant 1.406250e-01 : f32
    %39 = vector.broadcast %cst_11 : f32 to vector<4x13x13xf32>
    %40 = arith.mulf %39, %38 : vector<4x13x13xf32>
    %41 = arith.addf %37, %40 : vector<4x13x13xf32>
    %42 = vector.extract_strided_slice %0 {offsets = [0, 2, 2], sizes = [4, 13, 13], strides = [1, 1, 1]} : vector<4x16x16xf32> to vector<4x13x13xf32>
    %cst_12 = arith.constant 1.406250e-01 : f32
    %43 = vector.broadcast %cst_12 : f32 to vector<4x13x13xf32>
    %44 = arith.mulf %43, %42 : vector<4x13x13xf32>
    %45 = arith.addf %41, %44 : vector<4x13x13xf32>
    %46 = vector.extract_strided_slice %0 {offsets = [0, 2, 3], sizes = [4, 13, 13], strides = [1, 1, 1]} : vector<4x16x16xf32> to vector<4x13x13xf32>
    %cst_13 = arith.constant 4.687500e-02 : f32
    %47 = vector.broadcast %cst_13 : f32 to vector<4x13x13xf32>
    %48 = arith.mulf %47, %46 : vector<4x13x13xf32>
    %49 = arith.addf %45, %48 : vector<4x13x13xf32>
    %50 = vector.extract_strided_slice %0 {offsets = [0, 3, 0], sizes = [4, 13, 13], strides = [1, 1, 1]} : vector<4x16x16xf32> to vector<4x13x13xf32>
    %cst_14 = arith.constant 1.562500e-02 : f32
    %51 = vector.broadcast %cst_14 : f32 to vector<4x13x13xf32>
    %52 = arith.mulf %51, %50 : vector<4x13x13xf32>
    %53 = arith.addf %49, %52 : vector<4x13x13xf32>
    %54 = vector.extract_strided_slice %0 {offsets = [0, 3, 1], sizes = [4, 13, 13], strides = [1, 1, 1]} : vector<4x16x16xf32> to vector<4x13x13xf32>
    %cst_15 = arith.constant 4.687500e-02 : f32
    %55 = vector.broadcast %cst_15 : f32 to vector<4x13x13xf32>
    %56 = arith.mulf %55, %54 : vector<4x13x13xf32>
    %57 = arith.addf %53, %56 : vector<4x13x13xf32>
    %58 = vector.extract_strided_slice %0 {offsets = [0, 3, 2], sizes = [4, 13, 13], strides = [1, 1, 1]} : vector<4x16x16xf32> to vector<4x13x13xf32>
    %cst_16 = arith.constant 4.687500e-02 : f32
    %59 = vector.broadcast %cst_16 : f32 to vector<4x13x13xf32>
    %60 = arith.mulf %59, %58 : vector<4x13x13xf32>
    %61 = arith.addf %57, %60 : vector<4x13x13xf32>
    %62 = vector.extract_strided_slice %0 {offsets = [0, 3, 3], sizes = [4, 13, 13], strides = [1, 1, 1]} : vector<4x16x16xf32> to vector<4x13x13xf32>
    %cst_17 = arith.constant 1.562500e-02 : f32
    %63 = vector.broadcast %cst_17 : f32 to vector<4x13x13xf32>
    %64 = arith.mulf %63, %62 : vector<4x13x13xf32>
    %65 = arith.addf %61, %64 : vector<4x13x13xf32>
    %c0_18 = arith.constant 0 : index
    %c0_19 = arith.constant 0 : index
    %c0_20 = arith.constant 0 : index
    %66 = vector.load %arg2[%c0_18, %c0_19, %c0_20] : memref<4x13x13xf32, #tpu.memory_space<vmem>>, vector<4x13x13xf32>
    tpu.vector_store %arg2[%c0_18, %c0_19, %c0_20], %65 {strides = array<i32>} : memref<4x13x13xf32, #tpu.memory_space<vmem>>, vector<4x13x13xf32>,
    return
  }
  func.func @transform_0(%arg0: i32) -> (i32, i32, i32) {
    %c0_i32 = arith.constant 0 : i32
    %c0_i32_0 = arith.constant 0 : i32
    %c0_i32_1 = arith.constant 0 : i32
    return %arg0, %c0_i32, %c0_i32_0 : i32, i32, i32
  }
  func.func @transform_1(%arg0: i32) -> (i32, i32, i32) {
    %c0_i32 = arith.constant 0 : i32
    %c0_i32_0 = arith.constant 0 : i32
    %c0_i32_1 = arith.constant 0 : i32
    return %arg0, %c0_i32, %c0_i32_0 : i32, i32, i32
  }
}

</mosaic_0001>

<bundles_post_ra>
// kernel: tpu_custom_call.1
= control target key start
LH: loop header
LB: loop body
LE: loop exit
PB: predicated region body
PF: predicated region fallthrough
CT: control target
= control target key end

     0   :  { %6 = vsyncpa [#allocation3], 0  ;;  %s1447_s0 = inlined_call_operand.hbm [shape: f32[8,16,16], index: 0, kind: input, shape index: {}]   ;;  %s1448_s1 = inlined_call_operand.vmem [shape: f32[8,13,13], index: 1, kind: output, shape index: {}]  }
   0x1   :  { %8 = vsyncpa [#allocation3 + $0x1], 0  ;;  %s934_s6 = smov 0   ;;  %s936_s7 = smov 0  }
   0x2   :  { %s938_s8 = smov 0   ;;  %s940_s9 = smov 0  }
   0x3 LB: > { %s792_s10 = sadd.s32 4294967295, %s916_s9   ;;  %s954_s11 = sadd.s32 1, %s916_s9   ;;  %s916_s9 = sphi %s940_s9, %s1457_s9   ;;  %s912_s8 = sphi %s938_s8, %s1456_s8   ;;  %s908_s7 = sphi %s936_s7, %s1455_s7   ;;  %s904_s6 = sphi %s934_s6, %s1454_s6  }
   0x4   : > { %s18_s12 = ssub.s32 %s916_s9, %s954_s11  ;;  %s21_s13 = sadd.s32 1, %s912_s8 }
   0x5   : > { %p19_p0 = scmp.eq.s32.totalorder %s18_s12, 0  ;;  %p28_p1 = scmp.ne.s32.totalorder %s912_s8, %s908_s7 }
   0x6   : > { %p29_p2 = scmp.eq.s32.totalorder %s916_s9, 0  ;;  %p34_p3 = scmp.ne.s32.totalorder %s908_s7, %s904_s6 }
   0x7   : > { %s964_s14 = scalar_select %p19_p0, %s912_s8, %s21_s13  }
   0x8   : > { %p30_p4 = por %p29_p2, %p28_p1  ;;  %p35_p5 = scmp.eq.s32.totalorder %s792_s10, 0 }
   0x9   : > { %p816_p6 = scmp.lt.s32.totalorder %s916_s9, 2  ;;  %s84_s16 = sand.u32 1, %s912_s8  }
   0xa   : > { %p969_p7 = por %p35_p5, %p34_p3  ;;  %s796_s17 = sshll.u32 %s84_s16, 6 }
   0xb   : > { %s808_s18 = sshll.u32 %s916_s9, 10  ;;  %s88_s22 = scalar_lea.vmem [#allocation2], %s796_s17 }
   0xc   : > { %s1450_s15 = scalar_select %p969_p7, 1, 0 }
   0xd   : > { %s978_s21 = scalar_lea.hbm %s1447_s0, %s808_s18  ;;  %s96_s23 = sshll.u32 %s88_s22, 4  ;;  %s980_s23 = int_to_ptr.vmem [resolvable:$true] %s96_s23 }
   0xe   : > { %p982_p8 = pnand %p816_p6, %p30_p4  ;;  %s987_s25 = scalar_lea.sflag [#allocation3], %s84_s16 }
   0xf   : > { %s854_s26 = scalar_lea.hbm %s978_s21, 1024  ;;  %s859_s29 = scalar_lea.hbm %s1447_s0, 2048 }
  0x10   : > { %p855_p10 = scmp.ne.s32.totalorder %s978_s21, %s854_s26  ;;  %p856_p11 = pneg %p982_p8 }
  0x11   : > { %p860_p0 = scmp.lt.s32.totalorder %s978_s21, %s1447_s0  ;;  %p861_p1 = scmp.lt.s32.totalorder %s859_s29, %s854_s26 }
  0x12   : > { %p857_p12 = pnand %p856_p11, %p855_p10 }
  0x13   : > { %p862_p2 = por %p861_p1, %p860_p0 }
  0x14   : > { %p858_p13 = pneg %p857_p12 }
  0x16   : > { %p863_p3 = pnand %p862_p2, %p858_p13 }
  0x18   : > { %866 = shalt.err (!%p863_p3)
}
  0x19   : > { %s867_s3 = scalar_lea.vmem %s980_s23, 1024  ;;  %s918_s4 = smov [#allocation2]  }
  0x1a   : > { %p868_p4 = scmp.ne.s32.totalorder %s980_s23, %s867_s3  ;;  %s872_s5 = sshll.u32 %s918_s4, 4  ;;  %s873_s5 = int_to_ptr.vmem [resolvable:$false] %s872_s5 }
  0x1b   : > { %s874_s6 = scalar_lea.vmem %s873_s5, 2048  ;;  %p875_p10 = scmp.lt.s32.totalorder %s980_s23, %s873_s5 }
  0x1c   : > { %p870_p5 = pnand %p868_p4, %p856_p11  ;;  %p876_p12 = scmp.lt.s32.totalorder %s874_s6, %s867_s3 }
  0x1e   : > { %p871_p6 = pneg %p870_p5  ;;  %p877_p9 = por %p876_p12, %p875_p10 }
  0x20   : > { %p878_p7 = pnand %p877_p9, %p871_p6 }
  0x22   : > { %881 = shalt.err (!%p878_p7)
}
  0x23   : > { %s919_s12 = smov 128   ;;  %s920_s13 = smov 8  }
  0x24   : > { %815 = dma.hbm_to_vmem [thread:$0]  (!%p982_p8), %s978_s21, 1024, %s980_s23, %s987_s25, %s919_s12, %s919_s12, %s920_s13  }
  0x25   : > { %p104_p11 = scmp.lt.s32.totalorder %s916_s9, 3  ;;  %p1452_p13 = scmp.ge.s32.totalorder %s916_s9, 1 }
  0x27   : > { %p105_p0 = pnand %p1452_p13, %p104_p11 }
  0x28   : > { %s110_s16 = sand.u32 (!%p105_p0), 1, %s908_s7   ;;  %p1453_p7 = scmp.ne.s32.totalorder (!%p105_p0), %s1450_s15, 0 }
  0x29   : > { %108 = sbr.rel (%p105_p0) target bundleno = 357 (0x165), region = 24  ;;  %s801_s17 = sshll.u32 (!%p105_p0), %s110_s16, 6 }
  0x2a   : > { %s111_s18 = scalar_lea.sflag (!%p105_p0), [#allocation3], %s110_s16  ;;  %s114_s19 = scalar_lea.vmem (!%p105_p0), [#allocation2], %s801_s17 }
  0x2e   : > { %899 = dma.done.wait (%p1453_p7), %s111_s18, 1024  }
  0x2f   : > { %901 = vsyncadd (%p1453_p7), %s111_s18, 4294966272  ;;  %v1016_v0 = vld [vmem:[%s114_s19 + $0x10] sm:$0xff]  ;;  %v142_v1 = vld [vmem:[%s114_s19] sm:$0xff]  ;;  %s921_s20 = smov 127   ;;  %s922_s15 = smov 126   ;;  %vm576_vm0 = vcmask 1044480  }
  0x30   : > { %v1018_v2 = vld [vmem:[%s114_s19 + $0x18] sm:$0xff]  ;;  %v1021_v3 = vmul.f32 0.046875, %v1016_v0  ;;  %v1023_v4 = vmul.f32 0.046875, %v142_v1  ;;  %v143_v5 = vld [vmem:[%s114_s19 + $0x8] sm:$0xff]  ;;  %v146_v9 = vld [vmem:[%s114_s19 + $0x20] sm:$0xff]  ;;  %v1099_v26 = vmul.f32 0.015625, %v142_v1 }
  0x31   : > { %v1030_v6 = vmul.f32 0.046875, %v1018_v2  ;;  %v1032_v7 = vmul.f32 0.046875, %v143_v5  ;;  %v147_v8 = vld [vmem:[%s114_s19 + $0x28] sm:$0xff]  ;;  %v1040_v11 = vmul.f32 0.046875, %v146_v9  ;;  %v149_v12 = vld [vmem:[%s114_s19 + $0x38] sm:$0xff]  ;;  %v1042_v13 = vld [vmem:[%s114_s19 + $0x30] sm:$0xff] }
  0x32   : > { %186 = vrot.lane.b32.xlu1 %v1021_v3, %s921_s20  ;;  %182 = vrot.lane.b32.xlu0 %v1023_v4, %s921_s20  ;;  %v1038_v10 = vmul.f32 0.046875, %v147_v8  ;;  %v1048_v14 = vmul.f32 0.046875, %v149_v12  ;;  %v1051_v15 = vmul.f32 0.046875, %v1042_v13  ;;  %v605_v17 = vrot.slane %v1023_v4, 3  ;;  %s923_s21 = smov 125   ;;  %s802_s22 = sshll.u32 %s792_s10, 2 }
  0x33   : > { %v1058_v16 = vrot.slane %v1032_v7, 3  ;;  %v1066_v18 = vrot.slane %v1030_v6, 3  ;;  %v608_v19 = vrot.slane %v1021_v3, 3  ;;  %v611_v23 = vrot.slane %v1040_v11, 3  ;;  %p136_p8 = scmp.lt.s32.totalorder %s802_s22, 7 }
  0x34   : > { %v1082_v22 = vrot.slane %v1038_v10, 3  ;;  %v1097_v25 = vmul.f32 0.015625, %v143_v5  ;;  %v1102_v27 = vrot.slane %v1048_v14, 3  ;;  %v614_v28 = vrot.slane %v1051_v15, 3 }
  0x35   : > { %v1071_v20 = vsel %vm576_vm0, %v605_v17, %v1058_v16  ;;  %v1075_v21 = vsel %vm576_vm0, %v608_v19, %v1066_v18  ;;  %v1114_v30 = vmul.f32 0.015625, %v1018_v2  ;;  %v1117_v31 = vmul.f32 0.015625, %v1016_v0  ;;  %s1459_s22 = smov (!%p136_p8, %s802_s22), 7 }
  0x36   : > { %188 = vrot.lane.b32.xlu1 %v1030_v6, %s921_s20  ;;  %184 = vrot.lane.b32.xlu0 %v1032_v7, %s921_s20  ;;  %v1087_v24 = vsel %vm576_vm0, %v611_v23, %v1082_v22  ;;  %v1107_v29 = vsel %vm576_vm0, %v614_v28, %v1102_v27  ;;  %v1123_v32 = vmul.f32 0.015625, %v147_v8  ;;  %v1125_v33 = vmul.f32 0.015625, %v146_v9  ;;  %s809_s9 = sshll.u32 %s1459_s22, 4 }
  0x37   : > { %v316_v34 = vmul.f32 0.140625, %v143_v5  ;;  %v1127_v35 = vmul.f32 0.140625, %v142_v1  ;;  %v1133_v36 = vmul.f32 0.015625, %v149_v12  ;;  %v1136_v37 = vmul.f32 0.015625, %v1042_v13  ;;  %s1406_s24 = scalar_lea.vmem %s1448_s1, %s809_s9 }
  0x38   : > { %v318_v40 = vmul.f32 0.140625, %v1018_v2  ;;  %v1141_v41 = vmul.f32 0.140625, %v1016_v0  ;;  %vm286_vm1 = vcmask 1046528   ;;  %v320_v42 = vmul.f32 0.140625, %v147_v8 }
  0x39   : > { %v332_v38 = vrot.slane %v316_v34, 1  ;;  %v331_v39 = vrot.slane %v1127_v35, 1  ;;  %v319_v46 = vmul.f32 0.140625, %v146_v9  ;;  %v322_v47 = vmul.f32 0.140625, %v149_v12 }
  0x3a   : > { %192 = vrot.lane.b32.xlu1 %v1038_v10, %s921_s20  ;;  %190 = vrot.lane.b32.xlu0 %v1040_v11, %s921_s20  ;;  %v335_v44 = vrot.slane %v318_v40, 1  ;;  %v334_v45 = vrot.slane %v1141_v41, 1  ;;  %v338_v49 = vrot.slane %v320_v42, 1  ;;  %v321_v51 = vmul.f32 0.140625, %v1042_v13 }
  0x3b   : > { %v333_v43 = vsel %vm286_vm1, %v331_v39, %v332_v38  ;;  %v337_v50 = vrot.slane %v319_v46, 1  ;;  %v341_v53 = vrot.slane %v322_v47, 1  ;;  %v1168_v56 = vrot.slane %v1032_v7, 1 }
  0x3c   : > { %v336_v48 = vsel %vm286_vm1, %v334_v45, %v335_v44  ;;  %v340_v54 = vrot.slane %v321_v51, 1  ;;  %v287_v57 = vrot.slane %v1023_v4, 1  ;;  %v1178_v59 = vrot.slane %v1030_v6, 1 }
  0x3d   : > { %v339_v52 = vsel %vm286_vm1, %v337_v50, %v338_v49  ;;  %v290_v60 = vrot.slane %v1021_v3, 1  ;;  %v1190_v62 = vrot.slane %v1038_v10, 1  ;;  %v293_v63 = vrot.slane %v1040_v11, 1 }
  0x3e   : > { %196 = vrot.lane.b32.xlu1 %v1048_v14, %s921_s20  ;;  %194 = vrot.lane.b32.xlu0 %v1051_v15, %s921_s20  ;;  %v342_v55 = vsel %vm286_vm1, %v340_v54, %v341_v53  ;;  %v1175_v58 = vsel %vm286_vm1, %v287_v57, %v1168_v56  ;;  %v1202_v1 = vrot.slane %v1048_v14, 1  ;;  %v296_v2 = vrot.slane %v1051_v15, 1 }
  0x3f   : > { %v1187_v61 = vsel %vm286_vm1, %v290_v60, %v1178_v59  ;;  %v1199_v0 = vsel %vm286_vm1, %v293_v63, %v1190_v62  ;;  %v469_v8 = vrot.slane %v316_v34, 2  ;;  %v468_v9 = vrot.slane %v1127_v35, 2 }
  0x40   : > { %v1211_v5 = vsel %vm286_vm1, %v296_v2, %v1202_v1  ;;  %vm439_vm2 = vcmask 1045504   ;;  %v472_v13 = vrot.slane %v318_v40, 2  ;;  %v471_v17 = vrot.slane %v1141_v41, 2 }
  0x41   : > { %v470_v12 = vsel %vm439_vm2, %v468_v9, %v469_v8  ;;  %v475_v23 = vrot.slane %v320_v42, 2  ;;  %v474_v28 = vrot.slane %v319_v46, 2  ;;  %v478_v35 = vrot.slane %v322_v47, 2 }
  0x42   : > { %216 = vrot.lane.b32.xlu1 %v1032_v7, %s922_s15  ;;  %214 = vrot.lane.b32.xlu0 %v1023_v4, %s922_s15  ;;  %v473_v19 = vsel %vm439_vm2, %v471_v17, %v472_v13  ;;  %v1236_v42 = vrot.slane %v1032_v7, 2  ;;  %v443_v7 = vrot.slane %v1021_v3, 2  ;;  %vm715_vm3 = vcmask 102400  }
  0x43   : > { %v476_v34 = vsel %vm439_vm2, %v474_v28, %v475_v23  ;;  %vm713_vm4 = vcmask 105472  }
  0x46   : > { %220 = vrot.lane.b32.xlu1 %v1030_v6, %s922_s15  ;;  %218 = vrot.lane.b32.xlu0 %v1021_v3, %s922_s15 }
  0x4a   : > { %224 = vrot.lane.b32.xlu1 %v1038_v10, %s922_s15  ;;  %222 = vrot.lane.b32.xlu0 %v1040_v11, %s922_s15 }
  0x4e   : > { %228 = vrot.lane.b32.xlu1 %v1048_v14, %s922_s15  ;;  %226 = vrot.lane.b32.xlu0 %v1051_v15, %s922_s15 }
  0x52   : > { %256 = vrot.lane.b32.xlu1 %v1097_v25, %s923_s21  ;;  %254 = vrot.lane.b32.xlu0 %v1099_v26, %s923_s21 }
  0x56   : > { %260 = vrot.lane.b32.xlu1 %v1114_v30, %s923_s21  ;;  %258 = vrot.lane.b32.xlu0 %v1117_v31, %s923_s21 }
  0x5a   : > { %264 = vrot.lane.b32.xlu1 %v1123_v32, %s923_s21  ;;  %262 = vrot.lane.b32.xlu0 %v1125_v33, %s923_s21 }
  0x5e   : > { %268 = vrot.lane.b32.xlu1 %v1133_v36, %s923_s21  ;;  %266 = vrot.lane.b32.xlu0 %v1136_v37, %s923_s21 }
  0x62   : > { %345 = vrot.lane.b32.xlu1 %v332_v38, %s921_s20  ;;  %343 = vrot.lane.b32.xlu0 %v333_v43, %s921_s20 }
  0x66   : > { %349 = vrot.lane.b32.xlu1 %v335_v44, %s921_s20  ;;  %347 = vrot.lane.b32.xlu0 %v336_v48, %s921_s20 }
  0x6a   : > { %353 = vrot.lane.b32.xlu1 %v338_v49, %s921_s20  ;;  %351 = vrot.lane.b32.xlu0 %v339_v52, %s921_s20 }
  0x6e   : > { %357 = vrot.lane.b32.xlu1 %v341_v53, %s921_s20  ;;  %355 = vrot.lane.b32.xlu0 %v342_v55, %s921_s20 }
  0x72   : > { %377 = vrot.lane.b32.xlu1 %v332_v38, %s922_s15  ;;  %375 = vrot.lane.b32.xlu0 %v333_v43, %s922_s15  ;;  %v477_v38 = vrot.slane %v321_v51, 2  ;;  %v440_v43 = vrot.slane %v1023_v4, 2  ;;  %v1250_v4 = vrot.slane %v1030_v6, 2  ;;  %v1256_v51 = vrot.slane %v1038_v10, 2 }
  0x73   : > { %v446_v6 = vrot.slane %v1040_v11, 2  ;;  %v1270_v10 = vrot.slane %v1048_v14, 2 }
  0x74   : > { %v479_v39 = vsel %vm439_vm2, %v477_v38, %v478_v35  ;;  %v1243_v46 = vsel %vm439_vm2, %v440_v43, %v1236_v42  ;;  %v1262_v54 = vsel %vm439_vm2, %v443_v7, %v1250_v4 }
  0x75   : > { %v1276_v11 = vsel %vm439_vm2, %v446_v6, %v1256_v51 }
  0x76   : > { %381 = vrot.lane.b32.xlu1 %v335_v44, %s922_s15  ;;  %379 = vrot.lane.b32.xlu0 %v336_v48, %s922_s15 }
  0x7a   : > { %385 = vrot.lane.b32.xlu1 %v338_v49, %s922_s15  ;;  %383 = vrot.lane.b32.xlu0 %v339_v52, %s922_s15 }
  0x7e   : > { %389 = vrot.lane.b32.xlu1 %v341_v53, %s922_s15  ;;  %387 = vrot.lane.b32.xlu0 %v342_v55, %s922_s15 }
  0x82   : > { %409 = vrot.lane.b32.xlu1 %v1168_v56, %s923_s21  ;;  %407 = vrot.lane.b32.xlu0 %v1175_v58, %s923_s21 }
  0x86   : > { %413 = vrot.lane.b32.xlu1 %v1178_v59, %s923_s21  ;;  %411 = vrot.lane.b32.xlu0 %v1187_v61, %s923_s21 }
  0x8a   : > { %417 = vrot.lane.b32.xlu1 %v1190_v62, %s923_s21  ;;  %415 = vrot.lane.b32.xlu0 %v1199_v0, %s923_s21 }
  0x8e   : > { %421 = vrot.lane.b32.xlu1 %v1202_v1, %s923_s21  ;;  %419 = vrot.lane.b32.xlu0 %v1211_v5, %s923_s21 }
  0x92   : > { %482 = vrot.lane.b32.xlu1 %v469_v8, %s921_s20  ;;  %480 = vrot.lane.b32.xlu0 %v470_v12, %s921_s20 }
  0x96   : > { %486 = vrot.lane.b32.xlu1 %v472_v13, %s921_s20  ;;  %484 = vrot.lane.b32.xlu0 %v473_v19, %s921_s20 }
  0x9a   : > { %490 = vrot.lane.b32.xlu1 %v475_v23, %s921_s20  ;;  %488 = vrot.lane.b32.xlu0 %v476_v34, %s921_s20 }
  0x9e   : > { %494 = vrot.lane.b32.xlu1 %v478_v35, %s921_s20  ;;  %492 = vrot.lane.b32.xlu0 %v479_v39, %s921_s20 }
  0xa2   : > { %514 = vrot.lane.b32.xlu1 %v469_v8, %s922_s15  ;;  %512 = vrot.lane.b32.xlu0 %v470_v12, %s922_s15  ;;  %v449_v8 = vrot.slane %v1051_v15, 2 }
  0xa4   : > { %v187_v40 = vpop.permute.xlu1 %186  ;;  %v183_v41 = vpop.permute.xlu0 %182 }
  0xa5   : > { %v206_v52 = vadd.f32 %v183_v41, %v1099_v26  ;;  %v208_v63 = vadd.f32 %v187_v40, %v1117_v31 }
  0xa6   : > { %518 = vrot.lane.b32.xlu1 %v472_v13, %s922_s15  ;;  %516 = vrot.lane.b32.xlu0 %v473_v19, %s922_s15 }
  0xa8   : > { %v189_v44 = vpop.permute.xlu1 %188  ;;  %v185_v45 = vpop.permute.xlu0 %184 }
  0xa9   : > { %v207_v53 = vadd.f32 %v185_v45, %v1097_v25  ;;  %v209_v2 = vadd.f32 %v189_v44, %v1114_v30 }
  0xaa   : > { %522 = vrot.lane.b32.xlu1 %v475_v23, %s922_s15  ;;  %520 = vrot.lane.b32.xlu0 %v476_v34, %s922_s15  ;;  %v1287_v23 = vsel %vm439_vm2, %v449_v8, %v1270_v10 }
  0xac   : > { %v193_v47 = vpop.permute.xlu1 %192  ;;  %v191_v48 = vpop.permute.xlu0 %190 }
  0xad   : > { %v211_v14 = vadd.f32 %v193_v47, %v1123_v32  ;;  %v210_v19 = vadd.f32 %v191_v48, %v1125_v33 }
  0xae   : > { %546 = vrot.lane.b32.xlu1 %v1236_v42, %s923_s21  ;;  %544 = vrot.lane.b32.xlu0 %v1243_v46, %s923_s21 }
  0xb0   : > { %v197_v49 = vpop.permute.xlu1 %196  ;;  %v195_v50 = vpop.permute.xlu0 %194 }
  0xb1   : > { %v213_v38 = vadd.f32 %v197_v49, %v1133_v36 }
  0xb2   : > { %526 = vrot.lane.b32.xlu1 %v478_v35, %s922_s15  ;;  %524 = vrot.lane.b32.xlu0 %v479_v39, %s922_s15  ;;  %v212_v39 = vadd.f32 %v195_v50, %v1136_v37 }
  0xb4   : > { %v217_v3 = vpop.permute.xlu1 %216  ;;  %v215_v55 = vpop.permute.xlu0 %214 }
  0xb5   : > { %v239_v57 = vadd.f32 %v217_v3, %v207_v53  ;;  %v238_v60 = vadd.f32 %v215_v55, %v206_v52 }
  0xb6   : > { %550 = vrot.lane.b32.xlu1 %v1250_v4, %s923_s21  ;;  %548 = vrot.lane.b32.xlu0 %v1262_v54, %s923_s21 }
  0xb8   : > { %v221_v9 = vpop.permute.xlu1 %220  ;;  %v219_v12 = vpop.permute.xlu0 %218 }
  0xb9   : > { %v241_v13 = vadd.f32 %v221_v9, %v209_v2  ;;  %v240_v17 = vadd.f32 %v219_v12, %v208_v63 }
  0xba   : > { %554 = vrot.lane.b32.xlu1 %v1256_v51, %s923_s21  ;;  %552 = vrot.lane.b32.xlu0 %v1276_v11, %s923_s21 }
  0xbc   : > { %v225_v28 = vpop.permute.xlu1 %224  ;;  %v223_v15 = vpop.permute.xlu0 %222 }
  0xbd   : > { %v243_v34 = vadd.f32 %v225_v28, %v211_v14  ;;  %v242_v35 = vadd.f32 %v223_v15, %v210_v19  ;;  %v1324_v28 = vrot.slane %v1097_v25, 3 }
  0xbe   : > { %558 = vrot.lane.b32.xlu1 %v1270_v10, %s923_s21  ;;  %556 = vrot.lane.b32.xlu0 %v1287_v23, %s923_s21 }
  0xc0   : > { %v229_v40 = vpop.permute.xlu1 %228  ;;  %v227_v41 = vpop.permute.xlu0 %226 }
  0xc1   : > { %v245_v43 = vadd.f32 %v229_v40, %v213_v38  ;;  %v244_v44 = vadd.f32 %v227_v41, %v212_v39 }
  0xc2   : > { %619 = vrot.lane.b32.xlu1 %v1058_v16, %s921_s20  ;;  %617 = vrot.lane.b32.xlu0 %v1071_v20, %s921_s20 }
  0xc4   : > { %v257_v45 = vpop.permute.xlu1 %256  ;;  %v255_v47 = vpop.permute.xlu0 %254 }
  0xc5   : > { %v279_v48 = vadd.f32 %v257_v45, %v239_v57  ;;  %v278_v7 = vadd.f32 %v255_v47, %v238_v60 }
  0xc6   : > { %623 = vrot.lane.b32.xlu1 %v1066_v18, %s921_s20  ;;  %621 = vrot.lane.b32.xlu0 %v1075_v21, %s921_s20 }
  0xc7   : > { %v308_v9 = vadd.f32 %v1168_v56, %v279_v48  ;;  %v307_v12 = vadd.f32 %v1175_v58, %v278_v7  ;;  %v577_v56 = vrot.slane %v1099_v26, 3 }
  0xc8   : > { %v261_v49 = vpop.permute.xlu1 %260  ;;  %v259_v50 = vpop.permute.xlu0 %258 }
  0xc9   : > { %v281_v52 = vadd.f32 %v261_v49, %v241_v13  ;;  %v280_v53 = vadd.f32 %v259_v50, %v240_v17  ;;  %v1335_v25 = vsel %vm576_vm0, %v577_v56, %v1324_v28 }
  0xca   : > { %627 = vrot.lane.b32.xlu1 %v1082_v22, %s921_s20  ;;  %625 = vrot.lane.b32.xlu0 %v1087_v24, %s921_s20 }
  0xcb   : > { %v309_v19 = vadd.f32 %v1187_v61, %v280_v53 }
  0xcc   : > { %v265_v6 = vpop.permute.xlu1 %264  ;;  %v263_v3 = vpop.permute.xlu0 %262 }
  0xcd   : > { %v283_v55 = vadd.f32 %v265_v6, %v243_v34  ;;  %v282_v57 = vadd.f32 %v263_v3, %v242_v35 }
  0xce   : > { %651 = vrot.lane.b32.xlu1 %v1058_v16, %s922_s15  ;;  %649 = vrot.lane.b32.xlu0 %v1071_v20, %s922_s15  ;;  %v310_v20 = vadd.f32 %v1178_v59, %v281_v52 }
  0xd0   : > { %v269_v60 = vpop.permute.xlu1 %268  ;;  %v267_v63 = vpop.permute.xlu0 %266 }
  0xd1   : > { %v285_v2 = vadd.f32 %v269_v60, %v245_v43  ;;  %v284_v8 = vadd.f32 %v267_v63, %v244_v44 }
  0xd2   : > { %631 = vrot.lane.b32.xlu1 %v1102_v27, %s921_s20  ;;  %629 = vrot.lane.b32.xlu0 %v1107_v29, %s921_s20 }
  0xd4   : > { %v346_v13 = vpop.permute.xlu1 %345  ;;  %v344_v17 = vpop.permute.xlu0 %343 }
  0xd5   : > { %v368_v16 = vadd.f32 %v346_v13, %v308_v9  ;;  %v367_v14 = vadd.f32 %v344_v17, %v307_v12 }
  0xd6   : > { %655 = vrot.lane.b32.xlu1 %v1066_v18, %s922_s15  ;;  %653 = vrot.lane.b32.xlu0 %v1075_v21, %s922_s15  ;;  %v312_v18 = vadd.f32 %v1190_v62, %v283_v55  ;;  %v311_v21 = vadd.f32 %v1199_v0, %v282_v57  ;;  %v1344_v62 = vrot.slane %v1114_v30, 3  ;;  %v580_v0 = vrot.slane %v1117_v31, 3 }
  0xd7   : > { %v583_v30 = vrot.slane %v1125_v33, 3 }
  0xd8   : > { %v350_v58 = vpop.permute.xlu1 %349  ;;  %v348_v15 = vpop.permute.xlu0 %347 }
  0xd9   : > { %v370_v34 = vadd.f32 %v350_v58, %v310_v20  ;;  %v369_v35 = vadd.f32 %v348_v15, %v309_v19 }
  0xda   : > { %659 = vrot.lane.b32.xlu1 %v1082_v22, %s922_s15  ;;  %657 = vrot.lane.b32.xlu0 %v1087_v24, %s922_s15  ;;  %v314_v22 = vadd.f32 %v1202_v1, %v285_v2  ;;  %v313_v24 = vadd.f32 %v1211_v5, %v284_v8  ;;  %v1353_v1 = vsel %vm576_vm0, %v580_v0, %v1344_v62  ;;  %v1356_v5 = vrot.slane %v1123_v32, 3 }
  0xdb   : > { %v586_v32 = vrot.slane %v1136_v37, 3 }
  0xdc   : > { %v354_v59 = vpop.permute.xlu1 %353  ;;  %v352_v26 = vpop.permute.xlu0 %351 }
  0xdd   : > { %v372_v61 = vadd.f32 %v354_v59, %v312_v18  ;;  %v371_v38 = vadd.f32 %v352_v26, %v311_v21 }
  0xde   : > { %683 = vrot.lane.b32.xlu1 %v1324_v28, %s923_s21  ;;  %681 = vrot.lane.b32.xlu0 %v1335_v25, %s923_s21 }
  0xe0   : > { %v358_v39 = vpop.permute.xlu1 %357  ;;  %v356_v40 = vpop.permute.xlu0 %355 }
  0xe1   : > { %v374_v41 = vadd.f32 %v358_v39, %v314_v22  ;;  %v373_v43 = vadd.f32 %v356_v40, %v313_v24 }
  0xe2   : > { %663 = vrot.lane.b32.xlu1 %v1102_v27, %s922_s15  ;;  %661 = vrot.lane.b32.xlu0 %v1107_v29, %s922_s15  ;;  %v1365_v27 = vsel %vm576_vm0, %v583_v30, %v1356_v5  ;;  %v1368_v29 = vrot.slane %v1133_v36, 3 }
  0xe4   : > { %v378_v31 = vpop.permute.xlu1 %377  ;;  %v376_v44 = vpop.permute.xlu0 %375  ;;  %v1377_v50 = vsel %vm576_vm0, %v586_v32, %v1368_v29 }
  0xe5   : > { %v400_v45 = vadd.f32 %v378_v31, %v368_v16  ;;  %v399_v47 = vadd.f32 %v376_v44, %v367_v14 }
  0xe6   : > { %687 = vrot.lane.b32.xlu1 %v1344_v62, %s923_s21  ;;  %685 = vrot.lane.b32.xlu0 %v1353_v1, %s923_s21 }
  0xe8   : > { %v382_v33 = vpop.permute.xlu1 %381  ;;  %v380_v48 = vpop.permute.xlu0 %379 }
  0xe9   : > { %v402_v7 = vadd.f32 %v382_v33, %v370_v34  ;;  %v401_v49 = vadd.f32 %v380_v48, %v369_v35 }
  0xea   : > { %691 = vrot.lane.b32.xlu1 %v1356_v5, %s923_s21  ;;  %689 = vrot.lane.b32.xlu0 %v1365_v27, %s923_s21 }
  0xec   : > { %v386_v52 = vpop.permute.xlu1 %385  ;;  %v384_v53 = vpop.permute.xlu0 %383 }
  0xed   : > { %v404_v36 = vadd.f32 %v386_v52, %v372_v61  ;;  %v403_v6 = vadd.f32 %v384_v53, %v371_v38 }
  0xee   : > { %695 = vrot.lane.b32.xlu1 %v1368_v29, %s923_s21  ;;  %693 = vrot.lane.b32.xlu0 %v1377_v50, %s923_s21 }
  0xf0   : > { %v390_v37 = vpop.permute.xlu1 %389  ;;  %v388_v3 = vpop.permute.xlu0 %387 }
  0xf1   : > { %v406_v55 = vadd.f32 %v390_v37, %v374_v41  ;;  %v405_v57 = vadd.f32 %v388_v3, %v373_v43 }
  0xf4   : > { %v410_v60 = vpop.permute.xlu1 %409  ;;  %v408_v63 = vpop.permute.xlu0 %407 }
  0xf5   : > { %v432_v2 = vadd.f32 %v410_v60, %v400_v45  ;;  %v431_v8 = vadd.f32 %v408_v63, %v399_v47 }
  0xf7   : > { %v461_v35 = vadd.f32 %v1236_v42, %v432_v2  ;;  %v460_v18 = vadd.f32 %v1243_v46, %v431_v8 }
  0xf8   : > { %v414_v9 = vpop.permute.xlu1 %413  ;;  %v412_v12 = vpop.permute.xlu0 %411 }
  0xf9   : > { %v434_v13 = vadd.f32 %v414_v9, %v402_v7  ;;  %v433_v17 = vadd.f32 %v412_v12, %v401_v49 }
  0xfb   : > { %v463_v38 = vadd.f32 %v1250_v4, %v434_v13  ;;  %v462_v22 = vadd.f32 %v1262_v54, %v433_v17 }
  0xfc   : > { %v418_v16 = vpop.permute.xlu1 %417  ;;  %v416_v14 = vpop.permute.xlu0 %415 }
  0xfd   : > { %v436_v20 = vadd.f32 %v418_v16, %v404_v36  ;;  %v435_v19 = vadd.f32 %v416_v14, %v403_v6 }
  0xff   : > { %v465_v41 = vadd.f32 %v1256_v51, %v436_v20  ;;  %v464_v43 = vadd.f32 %v1276_v11, %v435_v19 }
 0x100   : > { %v422_v56 = vpop.permute.xlu1 %421  ;;  %v420_v58 = vpop.permute.xlu0 %419 }
 0x101   : > { %v438_v15 = vadd.f32 %v422_v56, %v406_v55  ;;  %v437_v34 = vadd.f32 %v420_v58, %v405_v57 }
 0x103   : > { %v467_v44 = vadd.f32 %v1270_v10, %v438_v15  ;;  %v466_v45 = vadd.f32 %v1287_v23, %v437_v34 }
 0x104   : > { %v483_v21 = vpop.permute.xlu1 %482  ;;  %v481_v59 = vpop.permute.xlu0 %480 }
 0x105   : > { %v505_v26 = vadd.f32 %v483_v21, %v461_v35  ;;  %v504_v61 = vadd.f32 %v481_v59, %v460_v18 }
 0x108   : > { %v487_v24 = vpop.permute.xlu1 %486  ;;  %v485_v0 = vpop.permute.xlu0 %484 }
 0x109   : > { %v507_v39 = vadd.f32 %v487_v24, %v463_v38  ;;  %v506_v40 = vadd.f32 %v485_v0, %v462_v22 }
 0x10c   : > { %v491_v30 = vpop.permute.xlu1 %490  ;;  %v489_v42 = vpop.permute.xlu0 %488 }
 0x10d   : > { %v509_v31 = vadd.f32 %v491_v30, %v465_v41  ;;  %v508_v46 = vadd.f32 %v489_v42, %v464_v43 }
 0x110   : > { %v495_v47 = vpop.permute.xlu1 %494  ;;  %v493_v4 = vpop.permute.xlu0 %492 }
 0x111   : > { %v1391_v32 = vadd.f32 %v495_v47, %v467_v44  ;;  %v1393_v54 = vadd.f32 %v493_v4, %v466_v45 }
 0x114   : > { %v515_v33 = vpop.permute.xlu1 %514  ;;  %v513_v48 = vpop.permute.xlu0 %512 }
 0x115   : > { %v537_v20 = vadd.f32 %v515_v33, %v505_v26  ;;  %v536_v19 = vadd.f32 %v513_v48, %v504_v61 }
 0x118   : > { %v519_v7 = vpop.permute.xlu1 %518  ;;  %v517_v51 = vpop.permute.xlu0 %516 }
 0x119   : > { %v539_v38 = vadd.f32 %v519_v7, %v507_v39  ;;  %v538_v22 = vadd.f32 %v517_v51, %v506_v40 }
 0x11c   : > { %v523_v49 = vpop.permute.xlu1 %522  ;;  %v521_v11 = vpop.permute.xlu0 %520 }
 0x11d   : > { %v541_v30 = vadd.f32 %v523_v49, %v509_v31  ;;  %v540_v42 = vadd.f32 %v521_v11, %v508_v46 }
 0x120   : > { %v547_v52 = vpop.permute.xlu1 %546  ;;  %v545_v53 = vpop.permute.xlu0 %544 }
 0x121   : > { %v569_v56 = vadd.f32 %v547_v52, %v537_v20  ;;  %v568_v58 = vadd.f32 %v545_v53, %v536_v19 }
 0x123   : > { %v598_v35 = vadd.f32 %v1324_v28, %v569_v56  ;;  %v597_v18 = vadd.f32 %v1335_v25, %v568_v58 }
 0x124   : > { %v527_v36 = vpop.permute.xlu1 %526  ;;  %v525_v6 = vpop.permute.xlu0 %524 }
 0x125   : > { %v543_v33 = vadd.f32 %v527_v36, %v1391_v32  ;;  %v542_v48 = vadd.f32 %v525_v6, %v1393_v54 }
 0x128   : > { %v551_v10 = vpop.permute.xlu1 %550  ;;  %v549_v37 = vpop.permute.xlu0 %548 }
 0x129   : > { %v571_v41 = vadd.f32 %v551_v10, %v539_v38  ;;  %v570_v26 = vadd.f32 %v549_v37, %v538_v22 }
 0x12b   : > { %v600_v47 = vadd.f32 %v1344_v62, %v571_v41  ;;  %v599_v31 = vadd.f32 %v1353_v1, %v570_v26 }
 0x12c   : > { %v555_v23 = vpop.permute.xlu1 %554  ;;  %v553_v3 = vpop.permute.xlu0 %552 }
 0x12d   : > { %v573_v44 = vadd.f32 %v555_v23, %v541_v30  ;;  %v572_v45 = vadd.f32 %v553_v3, %v540_v42 }
 0x12f   : > { %v602_v49 = vadd.f32 %v1356_v5, %v573_v44  ;;  %v601_v11 = vadd.f32 %v1365_v27, %v572_v45 }
 0x130   : > { %v559_v55 = vpop.permute.xlu1 %558  ;;  %v557_v57 = vpop.permute.xlu0 %556 }
 0x131   : > { %v575_v62 = vadd.f32 %v559_v55, %v543_v33  ;;  %v574_v1 = vadd.f32 %v557_v57, %v542_v48 }
 0x133   : > { %v604_v54 = vadd.f32 %v1368_v29, %v575_v62  ;;  %v603_v5 = vadd.f32 %v1377_v50, %v574_v1 }
 0x134   : > { %v620_v60 = vpop.permute.xlu1 %619  ;;  %v618_v63 = vpop.permute.xlu0 %617 }
 0x135   : > { %v642_v24 = vadd.f32 %v620_v60, %v598_v35  ;;  %v641_v0 = vadd.f32 %v618_v63, %v597_v18 }
 0x138   : > { %v624_v2 = vpop.permute.xlu1 %623  ;;  %v622_v8 = vpop.permute.xlu0 %621 }
 0x139   : > { %v644_v7 = vadd.f32 %v624_v2, %v600_v47  ;;  %v643_v51 = vadd.f32 %v622_v8, %v599_v31 }
 0x13c   : > { %v628_v9 = vpop.permute.xlu1 %627  ;;  %v626_v12 = vpop.permute.xlu0 %625 }
 0x13d   : > { %v646_v23 = vadd.f32 %v628_v9, %v602_v49  ;;  %v645_v3 = vadd.f32 %v626_v12, %v601_v11 }
 0x140   : > { %v652_v13 = vpop.permute.xlu1 %651  ;;  %v650_v17 = vpop.permute.xlu0 %649 }
 0x141   : > { %v674_v61 = vadd.f32 %v652_v13, %v642_v24  ;;  %v673_v43 = vadd.f32 %v650_v17, %v641_v0 }
 0x144   : > { %v1397_v16 = vpop.permute.xlu1 %631  ;;  %v1399_v14 = vpop.permute.xlu0 %629 }
 0x145   : > { %v648_v57 = vadd.f32 %v1397_v16, %v604_v54  ;;  %v647_v63 = vadd.f32 %v1399_v14, %v603_v5 }
 0x148   : > { %v656_v15 = vpop.permute.xlu1 %655  ;;  %v654_v34 = vpop.permute.xlu0 %653 }
 0x149   : > { %v676_v52 = vadd.f32 %v656_v15, %v644_v7  ;;  %v675_v53 = vadd.f32 %v654_v34, %v643_v51 }
 0x14c   : > { %v660_v21 = vpop.permute.xlu1 %659  ;;  %v658_v59 = vpop.permute.xlu0 %657 }
 0x14d   : > { %v678_v36 = vadd.f32 %v660_v21, %v646_v23  ;;  %v677_v6 = vadd.f32 %v658_v59, %v645_v3 }
 0x150   : > { %v684_v28 = vpop.permute.xlu1 %683  ;;  %v682_v25 = vpop.permute.xlu0 %681 }
 0x151   : > { %v706_v39 = vadd.f32 %v684_v28, %v674_v61  ;;  %v705_v40 = vadd.f32 %v682_v25, %v673_v43 }
 0x153   : > { %716 = vst.msk [vmem:[%s1406_s24 + $0x8] sm:$0x1f] %vm715_vm3, %v706_v39 }
 0x154   : > { %714 = vst.msk [vmem:[%s1406_s24] sm:$0xff] %vm713_vm4, %v705_v40  ;;  %v664_v46 = vpop.permute.xlu1 %663  ;;  %v662_v4 = vpop.permute.xlu0 %661 }
 0x155   : > { %v680_v9 = vadd.f32 %v664_v46, %v648_v57  ;;  %v679_v29 = vadd.f32 %v662_v4, %v647_v63 }
 0x158   : > { %v688_v10 = vpop.permute.xlu1 %687  ;;  %v686_v37 = vpop.permute.xlu0 %685 }
 0x159   : > { %v708_v60 = vadd.f32 %v688_v10, %v676_v52  ;;  %v707_v32 = vadd.f32 %v686_v37, %v675_v53 }
 0x15b   : > { %718 = vst.msk [vmem:[%s1406_s24 + $0x18] sm:$0x1f] %vm715_vm3, %v708_v60 }
 0x15c   : > { %717 = vst.msk [vmem:[%s1406_s24 + $0x10] sm:$0xff] %vm713_vm4, %v707_v32  ;;  %v692_v27 = vpop.permute.xlu1 %691  ;;  %v690_v55 = vpop.permute.xlu0 %689 }
 0x15d   : > { %v710_v2 = vadd.f32 %v692_v27, %v678_v36  ;;  %v709_v8 = vadd.f32 %v690_v55, %v677_v6 }
 0x15f   : > { %720 = vst.msk [vmem:[%s1406_s24 + $0x28] sm:$0x1f] %vm715_vm3, %v710_v2 }
 0x160   : > { %719 = vst.msk [vmem:[%s1406_s24 + $0x20] sm:$0xff] %vm713_vm4, %v709_v8  ;;  %v696_v50 = vpop.permute.xlu1 %695  ;;  %v694_v12 = vpop.permute.xlu0 %693 }
 0x161   : > { %v712_v13 = vadd.f32 %v696_v50, %v680_v9  ;;  %v711_v17 = vadd.f32 %v694_v12, %v679_v29 }
 0x163   : > { %722 = vst.msk [vmem:[%s1406_s24 + $0x38] sm:$0x1f] %vm715_vm3, %v712_v13 }
 0x164   : > { %721 = vst.msk [vmem:[%s1406_s24 + $0x30] sm:$0xff] %vm713_vm4, %v711_v17 }
 0x165 PF: > { %p11_p9 = scmp.ge.s32.totalorder %s954_s11, 4   ;;  %s1454_s6 = smov %s908_s7 }
 0x166   : > { %s1455_s7 = smov %s912_s8  ;;  %s1456_s8 = smov %s964_s14 }
 0x167   : > { %s1457_s9 = smov %s954_s11  ;;  %13 = sbr.rel (!%p11_p9) target bundleno = 3 (0x3), region = 64 }
 0x16c   :  { %747 = vsyncpa [#allocation3], 1 }
 0x16d   :  { %749 = vsyncpa [#allocation3 + $0x1], 1 }

</bundles_post_ra>
